<compile_context>
chip_gen: v6e
topology: v6e:2x2x1
jax: 0.10.0
libtpu: 0.0.40
codegen_flags: <defaults>
</compile_context>

<pallas_src>
import functools

import jax
import jax.numpy as jnp
from jax.experimental import pallas as pl
from jax.experimental.pallas import tpu as pltpu


def _range_norm_kernel(x_ref, o_ref, *, full_norm: bool, eps: float):
    # x_ref / o_ref: (bt, N) block, N = H*W. Per-row range normalization.
    x = x_ref[...].astype(jnp.float32)

    xmax = jnp.max(x, axis=-1, keepdims=True)           # (bt, 1)
    if full_norm:
        xmin = jnp.min(x, axis=-1, keepdims=True)       # (bt, 1)
        nval = x - xmin
        rng = xmax - xmin
    else:
        nval = x
        rng = xmax

    # prevent divide-by-zero: clamp range to eps (torch.where semantics)
    rng = jnp.where(rng > eps, rng, jnp.float32(eps))

    # One divide per row, then a broadcast multiply over the (bt, N) tile —
    # keeps the VPU slot nearly free compared with a per-element divide.
    inv = 1.0 / rng                                      # (bt, 1)
    o_ref[...] = (nval * inv).astype(o_ref.dtype)


def _choose_block_rows(B, row_bytes, block_rows=None, target_bytes=1 << 20):
    """Pick how many batch rows to fuse per grid step.

    Returns (bt, padded_B) with padded_B a multiple of bt. bt is either the
    full (padded) batch extent or a multiple of 8 (sublane constraint).
    """
    if block_rows is not None:
        bt = max(1, int(block_rows))
    else:
        bt = max(1, target_bytes // max(1, row_bytes))
        # v7x has 2 TensorCores: prefer >= 2 parallel grid steps as long as
        # each block stays >= 256 KiB (big enough to amortize step overhead).
        if bt >= B and B >= 2 and (B // 2) * row_bytes >= (256 << 10):
            bt = B // 2
    if bt >= B:
        return B, B
    # A second-to-last block dim that is not the full array extent must be a
    # multiple of 8 (sublane tiling).
    bt = max(8, (bt // 8) * 8)
    if bt >= B:
        return B, B
    padded_B = ((B + bt - 1) // bt) * bt
    return bt, padded_B


def range_norm_2d(x, full_norm: bool = True, eps: float = 1e-9, *, block_rows=None):
    """Pallas equivalent of RangeNorm2D.forward.

    Args:
      x: array of shape [B, H, W], any real dtype.
    Returns:
      array of shape [B, H, W], each batch item normalized to [0, 1].
    """
    assert x.ndim == 3, "Input should be sizes [batch size x height x width]"
    B, H, W = x.shape
    N = H * W
    row_bytes = N * jnp.dtype(x.dtype).itemsize

    # Layout plumbing only: the reduction is over all of H*W anyway.
    xf = x.reshape(B, N)
    bt, padded_B = _choose_block_rows(B, row_bytes, block_rows)
    if padded_B != B:
        # Zero-padded rows normalize to 0/eps = 0 and are sliced off below.
        xf = jnp.pad(xf, ((0, padded_B - B), (0, 0)))

    kernel = functools.partial(_range_norm_kernel, full_norm=full_norm, eps=eps)

    out = pl.pallas_call(
        kernel,
        out_shape=jax.ShapeDtypeStruct((padded_B, N), x.dtype),
        grid_spec=pltpu.PrefetchScalarGridSpec(
            num_scalar_prefetch=0,
            grid=(padded_B // bt,),
            in_specs=[pl.BlockSpec((bt, N), lambda i: (i, 0))],
            out_specs=pl.BlockSpec((bt, N), lambda i: (i, 0)),
        ),
        compiler_params=pltpu.CompilerParams(
            dimension_semantics=("parallel",),
            # ~1 MiB blocks x (in + out) x double buffering ≈ 4 MiB; set the
            # scoped-VMEM limit explicitly so the same config clears v5e's
            # 16 MiB default and stays well under v7x's 64 MiB physical VMEM.
            vmem_limit_bytes=32 * 1024 * 1024,
        ),
    )(xf)

    if padded_B != B:
        out = out[:B]
    return out.reshape(B, H, W)


def _reference(x, full_norm=True, eps=1e-9):
    # Pure-JAX reference reproducing the PyTorch forward exactly.
    B, H, W = x.shape
    xf = x.reshape(B, H * W).astype(jnp.float32)
    xmax = xf.max(axis=1, keepdims=True)
    if full_norm:
        xmin = xf.min(axis=1, keepdims=True)
        nval = xf - xmin
        rng = xmax - xmin
    else:
        nval = xf
        rng = xmax
    rng = jnp.where(rng > eps, rng, jnp.full_like(rng, eps))
    return (nval / rng).reshape(B, H, W).astype(x.dtype)


if __name__ == "__main__":
    key = jax.random.PRNGKey(0)

    # Primary case: small positive saliency maps, as the module docstring suggests.
    B, H, W = 2, 16, 16
    x = jax.random.uniform(key, (B, H, W), dtype=jnp.float32) * 5.0

    out = jax.block_until_ready(range_norm_2d(x, full_norm=True, eps=1e-9))
    ref = _reference(x, full_norm=True, eps=1e-9)
    assert out.shape == (B, H, W)
    assert jnp.allclose(out, ref, atol=1e-6, rtol=1e-6), "mismatch vs reference"

    # full_norm=False path.
    out2 = jax.block_until_ready(range_norm_2d(x, full_norm=False))
    ref2 = _reference(x, full_norm=False)
    assert jnp.allclose(out2, ref2, atol=1e-6, rtol=1e-6), "mismatch (full_norm=False)"

    # Multi-block path: bt < B (batch padding) and H*W not a multiple of 128.
    key2 = jax.random.PRNGKey(1)
    x3 = jax.random.uniform(key2, (10, 8, 24), dtype=jnp.float32) * 3.0
    out3 = jax.block_until_ready(range_norm_2d(x3, full_norm=True, block_rows=8))
    ref3 = _reference(x3, full_norm=True)
    assert jnp.allclose(out3, ref3, atol=1e-6, rtol=1e-6), "mismatch (multi-block)"

    print("KERNEL_OK")
</pallas_src>

<mosaic_0001>
module attributes {stable_mosaic.version = 11 : i64} {
  func.func @_range_norm_kernel(%arg0: i32, %arg1: memref<2x256xf32, #tpu.memory_space<vmem>>, %arg2: memref<2x256xf32, #tpu.memory_space<vmem>>) attributes {dimension_semantics = [#tpu.dimension_semantics<parallel>], iteration_bounds = array<i64: 1>, scalar_prefetch = 0 : i64, scratch_operands = 0 : i64, tpu.core_type = #tpu.core_type<tc>, window_params = [{transform_indices = @transform_0, window_bounds = array<i64: 2, 256>}, {transform_indices = @transform_1, window_bounds = array<i64: 2, 256>}]} {
    %c0 = arith.constant 0 : index
    %c0_0 = arith.constant 0 : index
    %0 = vector.load %arg1[%c0, %c0_0] : memref<2x256xf32, #tpu.memory_space<vmem>>, vector<2x256xf32>
    %cst = arith.constant dense<0xFF800000> : vector<2xf32>
    %1 = vector.multi_reduction <maximumf>, %0, %cst [1] : vector<2x256xf32> to vector<2xf32>
    %2 = vector.shape_cast %1 : vector<2xf32> to vector<2x1xf32>
    %cst_1 = arith.constant dense<0x7F800000> : vector<2xf32>
    %3 = vector.multi_reduction <minimumf>, %0, %cst_1 [1] : vector<2x256xf32> to vector<2xf32>
    %4 = vector.shape_cast %3 : vector<2xf32> to vector<2x1xf32>
    %5 = vector.broadcast %4 : vector<2x1xf32> to vector<2x256xf32>
    %6 = arith.subf %0, %5 : vector<2x256xf32>
    %7 = arith.subf %2, %4 : vector<2x1xf32>
    %cst_2 = arith.constant 9.99999971E-10 : f32
    %8 = vector.broadcast %cst_2 : f32 to vector<2x1xf32>
    %9 = arith.cmpf ogt, %7, %8 : vector<2x1xf32>
    %cst_3 = arith.constant 9.99999971E-10 : f32
    %10 = vector.broadcast %cst_3 : f32 to vector<2x1xf32>
    %11 = arith.select %9, %7, %10 : vector<2x1xi1>, vector<2x1xf32>
    %cst_4 = arith.constant 1.000000e+00 : f32
    %12 = vector.broadcast %cst_4 : f32 to vector<2x1xf32>
    %13 = arith.divf %12, %11 : vector<2x1xf32>
    %14 = vector.broadcast %13 : vector<2x1xf32> to vector<2x256xf32>
    %15 = arith.mulf %6, %14 : vector<2x256xf32>
    %c0_5 = arith.constant 0 : index
    %c0_6 = arith.constant 0 : index
    %16 = vector.load %arg2[%c0_5, %c0_6] : memref<2x256xf32, #tpu.memory_space<vmem>>, vector<2x256xf32>
    tpu.vector_store %arg2[%c0_5, %c0_6], %15 {strides = array<i32>} : memref<2x256xf32, #tpu.memory_space<vmem>>, vector<2x256xf32>,
    return
  }
  func.func @transform_0(%arg0: i32) -> (i32, i32) {
    %c0_i32 = arith.constant 0 : i32
    %c0_i32_0 = arith.constant 0 : i32
    return %arg0, %c0_i32 : i32, i32
  }
  func.func @transform_1(%arg0: i32) -> (i32, i32) {
    %c0_i32 = arith.constant 0 : i32
    %c0_i32_0 = arith.constant 0 : i32
    return %arg0, %c0_i32 : i32, i32
  }
}

</mosaic_0001>

<bundles_post_ra>
// kernel: tpu_custom_call.1
= control target key start
LH: loop header
LB: loop body
LE: loop exit
PB: predicated region body
PF: predicated region fallthrough
CT: control target
= control target key end

     0   :  { %6 = vsyncpa [#allocation3], 0  ;;  %s155_s0 = inlined_call_operand.hbm [shape: f32[2,256], index: 0, kind: input, shape index: {}]   ;;  %s156_s1 = inlined_call_operand.hbm [shape: f32[2,256], index: 1, kind: output, shape index: {}]  }
   0x1   :  { %7 = vsyncpa [#allocation4], 0  ;;  %s135_s6 = smov [#allocation2]  }
   0x2   :  { %s14_s7 = sshll.u32 %s135_s6, 4  ;;  %s15_s7 = int_to_ptr.vmem [resolvable:$true] %s14_s7 }
   0x3   :  { %s99_s8 = scalar_lea.vmem %s15_s7, 64  ;;  %p104_p1 = scmp.lt.s32.totalorder %s15_s7, %s15_s7 }
   0x4   :  { %p100_p0 = scmp.ne.s32.totalorder %s15_s7, %s99_s8  ;;  %p105_p2 = scmp.lt.s32.totalorder %s99_s8, %s99_s8 }
   0x6   :  { %p106_p3 = por %p105_p2, %p104_p1 }
   0x8   :  { %p107_p4 = pnand %p106_p3, %p100_p0 }
   0xa   :  { %110 = shalt.err (!%p107_p4)
}
   0xb   :  { %17 = dma.hbm_to_vmem [thread:$0]  %s155_s0, 64, %s15_s7, [#allocation3]  }
   0xc   :  { %131 = dma.done.wait [#allocation3], 64  }
   0xd   :  { %132 = vsyncadd [#allocation3], 4294967232  ;;  %v26_v0 = vlaneseq  ;;  %v136_v1 = vmov 1983009808   ;;  %v21_v6 = vld [vmem:[#allocation2] sm:$0xf] }
   0xe   :  { %v24_v2 = vunpack.c.l.s4 %v136_v1  ;;  %vm33_vm0 = vcmask 1041408   ;;  %v137_v18 = vmov 269488144   ;;  %s138_s0 = smov [#allocation5]  }
   0xf   :  { %v27_v3 = vshrl.u32 %v26_v0, 7  ;;  %v46_v19 = vunpack.c.l.s4 %v137_v18  ;;  %s76_s11 = sshll.u32 %s138_s0, 4  ;;  %s77_s11 = int_to_ptr.vmem [resolvable:$true] %s76_s11 }
  0x10   :  { %v25_v4 = vunpack.c.0.s8 %v24_v2  ;;  %s111_s12 = scalar_lea.vmem %s77_s11, 64  ;;  %p116_p6 = scmp.lt.s32.totalorder %s77_s11, %s77_s11 }
  0x11   :  { %v47_v21 = vunpack.c.0.s8 %v46_v19  ;;  %p112_p5 = scmp.ne.s32.totalorder %s77_s11, %s111_s12  ;;  %p117_p7 = scmp.lt.s32.totalorder %s111_s12, %s111_s12 }
  0x12   :  { %v28_v5 = vsub.s32 %v25_v4, %v27_v3 }
  0x13   :  { %v50_v22 = vsub.s32 %v47_v21, %v27_v3  ;;  %p118_p8 = por %p117_p7, %p116_p6 }
  0x14   :  { %v29_v7 = vrot.slane %v21_v6, %v28_v5 }
  0x15   :  { %p119_p9 = pnand %p118_p8, %p112_p5 }
  0x16   :  { %v30_v8 = vcombine.high %v29_v7, %v29_v7  ;;  %v34_v9 = vsel %vm33_vm0, %v29_v7, -inf  ;;  %v39_v11 = vsel %vm33_vm0, %v29_v7, inf }
  0x18   :  { %v35_v10 = vsel %vm33_vm0, %v30_v8, -inf  ;;  %v40_v12 = vsel %vm33_vm0, %v30_v8, inf }
  0x19   :  { %v36_v13 = vmax.f32 %v34_v9, %v35_v10  ;;  %v41_v14 = vmin.f32 %v39_v11, %v40_v12 }
  0x1b   :  { %37 = vmax.xlane.f32.xlu0 %v36_v13 }
  0x1f   :  { %42 = vmin.xlane.f32.xlu0 %v41_v14 }
  0xa4   :  { %v38_v15 = vpop.xlane.xlu0 %37 }
  0xa8   :  { %v43_v16 = vpop.xlane.xlu0 %42 }
  0xa9   :  { %v54_v17 = vsub.f32 %v38_v15, %v43_v16  ;;  %v51_v23 = vrot.slane %v43_v16, %v50_v22 }
  0xab   :  { %vm55_vm1 = vcmp.gt.f32.partialorder %v54_v17, 1e-09  ;;  %v53_v25 = vsub.f32 %v21_v6, %v51_v23 }
  0xac   :  { %v56_v20 = vsel %vm55_vm1, %v54_v17, 1e-09 }
  0xad   :  { %89 = vrcp.f32 %v56_v20 }
  0xba   :  { %v90_v24 = vpop.eup %89 }
  0xbb   :  { %v66_v26 = vrot.slane %v90_v24, %v50_v22 }
  0xbd   :  { %v68_v27 = vmul.f32 %v66_v26, %v53_v25 }
  0xbf   :  { %69 = vst [vmem:[#allocation5] sm:$0xf] %v68_v27 }
  0xc0   :  { %122 = shalt.err (!%p119_p9)
}
  0xc1   :  { %79 = dma.vmem_to_hbm [thread:$0]  %s77_s11, 64, %s156_s1, [#allocation4]  }
  0xc2   :  { %133 = dma.done.wait [#allocation4], 64  }
  0xc3   :  { %134 = vsyncadd [#allocation4], 4294967232 }
  0xc4   :  { %83 = vsyncpa [#allocation3], 1 }
  0xc5   :  { %84 = vsyncpa [#allocation4], 1 }

</bundles_post_ra>
